<compile_context>
chip_gen: v5e
topology: v5e:2x2
jax: 0.10.0
libtpu: 0.0.40
codegen_flags: <defaults>
</compile_context>

<pallas_src>
import functools

import jax
import jax.numpy as jnp
from jax.experimental import pallas as pl
from jax.experimental.pallas import tpu as pltpu

_PACK = 8    # batch rows packed per sublane row (8 * F lanes per row)
_HID = 32    # hidden width after the fused Linear(F,64)->Linear(64,32)


def _round_up(n, m):
    return ((n + m - 1) // m) * m


def mlp_kernel(xp_ref, w12p_ref, b12p_ref, w3p_ref, b3_ref, o_ref, *,
               compute_dtype, approx_sigmoid):
    """One batch tile; 8 batch rows are packed per sublane row.

    xp_ref   : (TBS, 8*F)    f32            -- x tile, natural row-major bytes
    w12p_ref : (8*F, 8*32)   compute dtype  -- kron(I8, w1 @ w2)
    b12p_ref : (1, 8*32)     f32            -- tile(b1 @ w2 + b2, 8)
    w3p_ref  : (8*32, 8)     f32            -- kron(I8, w3)
    b3_ref   : (1, 1)        f32, SMEM      -- scalar head bias
    o_ref    : (TBS, 8)      f32            -- sigmoid output slab
    """
    # In-kernel cast (no extra wrapper HBM pass over x).
    xp = xp_ref[...].astype(compute_dtype)

    # Fused Linear(F->64) + Dropout(identity, eval) + Linear(64->32): one
    # canonical MXU matmul, f32 accumulation.
    hp = jnp.dot(xp, w12p_ref[...], preferred_element_type=jnp.float32)
    hp = jnp.maximum(hp + b12p_ref[...], 0.0)            # bias + ReLU (f32 VPU)

    # Linear(32 -> 1) head, also on the MXU (uses its slack; frees VALU/XLU).
    zp = jnp.dot(hp, w3p_ref[...], preferred_element_type=jnp.float32)
    zp = zp + b3_ref[0, 0]

    # Sigmoid epilogue on the EUP.
    ez = jnp.exp(-zp)
    if approx_sigmoid:
        o_ref[...] = pl.reciprocal(1.0 + ez, approx=True)
    else:
        o_ref[...] = 1.0 / (1.0 + ez)                     # exact f32 path


@functools.partial(jax.jit, static_argnames=("tile_b", "use_bf16"))
def pollution_mlp_forward(x, params, *, tile_b=32768, use_bf16=True):
    """x: (B, input_size) float32; params dict with w1,b1,w2,b2,w3,b3.

    Weights are stored (in_features, out_features); biases as (1, out_features).
    """
    assert tile_b % 128 == 0, "tile_b must be a multiple of 128"
    B, F = x.shape
    P, H = _PACK, _HID
    compute_dtype = jnp.bfloat16 if use_bf16 else jnp.float32

    # --- Eval-mode fusion of Linear1 (+ identity Dropout) and Linear2, then
    # --- "pack" the tiny weights into block-diagonal form (O(F*32*P) work).
    w12 = params["w1"] @ params["w2"]                       # (F, 32)
    b12 = params["b1"] @ params["w2"] + params["b2"]        # (1, 32)
    eye = jnp.eye(P, dtype=jnp.float32)
    w12p = jnp.kron(eye, w12).astype(compute_dtype)         # (P*F, P*32)
    b12p = jnp.tile(b12, (1, P)).astype(jnp.float32)        # (1, P*32)
    w3p = jnp.kron(eye, params["w3"]).astype(jnp.float32)   # (P*32, P)
    b3 = params["b3"].reshape(1, 1).astype(jnp.float32)     # (1, 1)

    # --- Batch padding / tiling.  Pad only to a multiple of 128 (zero-copy
    # --- when already aligned); x is NOT transposed or cast here.
    B_pad = _round_up(B, 128)
    if B_pad != B:
        x = jnp.pad(x, ((0, B_pad - B), (0, 0)))
    xp = x.reshape(B_pad // P, P * F)          # free reshape of contiguous bytes

    TB = min(tile_b, B_pad)
    # v7x has two TensorCores: give the "parallel" batch axis >= 4 tiles once a
    # quarter-batch tile is still big enough to amortize per-step overhead.
    quarter = _round_up(-(-B_pad // 4), 128)
    if quarter >= 8192:
        TB = min(TB, quarter)
    TBS = TB // P                              # sublane rows per tile
    n_tiles = pl.cdiv(B_pad, TB)               # edge tile (if any) is masked

    # Explicit VMEM budget: double-buffered x tiles + in-kernel bf16 copy +
    # f32 hidden temporaries + double-buffered (lane-padded) output slabs.
    x_tile_bytes = TBS * (P * F) * 4
    vmem_bytes = (2 * x_tile_bytes + x_tile_bytes // 2
                  + 4 * TBS * (P * H) * 4
                  + 2 * TBS * 128 * 4
                  + (2 << 20))
    vmem_limit = min(max(vmem_bytes, 32 * 1024 * 1024), 48 * 1024 * 1024)

    kernel = functools.partial(mlp_kernel, compute_dtype=compute_dtype,
                               approx_sigmoid=use_bf16)

    out = pl.pallas_call(
        kernel,
        out_shape=jax.ShapeDtypeStruct((B_pad // P, P), jnp.float32),
        grid=(n_tiles,),
        in_specs=[
            pl.BlockSpec((TBS, P * F), lambda i: (i, 0)),       # streamed x tile
            pl.BlockSpec((P * F, P * H), lambda i: (0, 0)),     # resident weights
            pl.BlockSpec((1, P * H), lambda i: (0, 0)),
            pl.BlockSpec((P * H, P), lambda i: (0, 0)),
            pl.BlockSpec(memory_space=pltpu.MemorySpace.SMEM),  # scalar head bias
        ],
        out_specs=pl.BlockSpec((TBS, P), lambda i: (i, 0)),     # dense output slab
        compiler_params=pltpu.CompilerParams(
            dimension_semantics=("parallel",),
            vmem_limit_bytes=vmem_limit),
    )(xp, w12p, b12p, w3p, b3)

    # Free reshape back to (B, 1); padded rows (finite garbage) are sliced off.
    return out.reshape(B_pad, 1)[:B]


def init_params(key, input_size):
    """Deterministic synthetic parameters matching PyTorch layer shapes.

    PyTorch Linear stores weight as (out, in); we store the transpose (in, out)
    so y = x @ W + b."""
    k1, k2, k3 = jax.random.split(key, 3)

    def linear(k, fan_in, fan_out):
        bound = 1.0 / jnp.sqrt(fan_in)
        kw, kb = jax.random.split(k)
        w = jax.random.uniform(kw, (fan_in, fan_out), jnp.float32, -bound, bound)
        b = jax.random.uniform(kb, (1, fan_out), jnp.float32, -bound, bound)
        return w, b

    w1, b1 = linear(k1, input_size, 64)
    w2, b2 = linear(k2, 64, 32)
    w3, b3 = linear(k3, 32, 1)
    return {"w1": w1, "b1": b1, "w2": w2, "b2": b2, "w3": w3, "b3": b3}


def reference_forward(x, params):
    """Pure-JAX eval-mode reference for correctness check."""
    h1 = x @ params["w1"] + params["b1"]
    h2 = jnp.maximum(h1 @ params["w2"] + params["b2"], 0.0)
    h3 = h2 @ params["w3"] + params["b3"]
    return jax.nn.sigmoid(h3)


if __name__ == "__main__":
    key = jax.random.PRNGKey(0)
    kx, kp = jax.random.split(key)

    batch, input_size = 8, 16
    x = jax.random.normal(kx, (batch, input_size), jnp.float32)
    params = init_params(kp, input_size)
    ref = reference_forward(x, params)

    # Default path: bf16 MXU inputs, f32 accumulation, approx-reciprocal sigmoid.
    out = jax.block_until_ready(pollution_mlp_forward(x, params))
    assert out.shape == (batch, 1)
    assert jnp.max(jnp.abs(out - ref)) < 3e-2, "bf16 kernel mismatch vs reference"

    # Full-f32 path with exact sigmoid (precision reference).
    out_f32 = jax.block_until_ready(pollution_mlp_forward(x, params, use_bf16=False))
    assert jnp.max(jnp.abs(out_f32 - ref)) < 1e-3, "f32 kernel mismatch vs reference"

    # Multi-tile + batch-padding path (batch not a multiple of 128).
    batch2 = 300
    x2 = jax.random.normal(kx, (batch2, input_size), jnp.float32)
    ref2 = reference_forward(x2, params)
    out2 = jax.block_until_ready(pollution_mlp_forward(x2, params, tile_b=128))
    assert out2.shape == (batch2, 1)
    assert jnp.max(jnp.abs(out2 - ref2)) < 3e-2, "tiled kernel mismatch vs reference"

    print("KERNEL_OK")
</pallas_src>

<mosaic_0001>
module attributes {stable_mosaic.version = 11 : i64} {
  func.func @mlp_kernel(%arg0: i32, %arg1: memref<16x128xf32, #tpu.memory_space<vmem>>, %arg2: memref<128x256xbf16, #tpu.memory_space<vmem>>, %arg3: memref<1x256xf32, #tpu.memory_space<vmem>>, %arg4: memref<256x8xf32, #tpu.memory_space<vmem>>, %arg5: memref<1x1xf32, #tpu.memory_space<smem>>, %arg6: memref<16x8xf32, #tpu.memory_space<vmem>>) attributes {dimension_semantics = [#tpu.dimension_semantics<parallel>], iteration_bounds = array<i64: 1>, scalar_prefetch = 0 : i64, scratch_operands = 0 : i64, tpu.core_type = #tpu.core_type<tc>, window_params = [{transform_indices = @transform_0, window_bounds = array<i64: 16, 128>}, {pipeline_mode = #tpu.pipeline_mode<synchronous>, transform_indices = @transform_1, window_bounds = array<i64: 128, 256>}, {pipeline_mode = #tpu.pipeline_mode<synchronous>, transform_indices = @transform_2, window_bounds = array<i64: 1, 256>}, {pipeline_mode = #tpu.pipeline_mode<synchronous>, transform_indices = @transform_3, window_bounds = array<i64: 256, 8>}, {transform_indices = @transform_4, window_bounds = array<i64: 1, 1>}, {transform_indices = @transform_5, window_bounds = array<i64: 16, 8>}]} {
    %c0 = arith.constant 0 : index
    %c0_0 = arith.constant 0 : index
    %0 = vector.load %arg1[%c0, %c0_0] : memref<16x128xf32, #tpu.memory_space<vmem>>, vector<16x128xf32>
    %1 = arith.truncf %0 : vector<16x128xf32> to vector<16x128xbf16>
    %c0_1 = arith.constant 0 : index
    %c0_2 = arith.constant 0 : index
    %2 = vector.load %arg2[%c0_1, %c0_2] : memref<128x256xbf16, #tpu.memory_space<vmem>>, vector<128x256xbf16>
    %cst = arith.constant dense<0.000000e+00> : vector<16x256xf32>
    %3 = tpu.matmul %1, %2, %cst {dimension_numbers = #tpu.dot_dimension_numbers<[1], [0], [0], [1], [0, 0, 1, 1], [], []>} : vector<16x128xbf16>, vector<128x256xbf16>, vector<16x256xf32> -> vector<16x256xf32>
    %c0_3 = arith.constant 0 : index
    %c0_4 = arith.constant 0 : index
    %4 = vector.load %arg3[%c0_3, %c0_4] : memref<1x256xf32, #tpu.memory_space<vmem>>, vector<1x256xf32>
    %5 = vector.broadcast %4 : vector<1x256xf32> to vector<16x256xf32>
    %6 = arith.addf %3, %5 : vector<16x256xf32>
    %cst_5 = arith.constant 0.000000e+00 : f32
    %7 = vector.broadcast %cst_5 : f32 to vector<16x256xf32>
    %8 = arith.maximumf %6, %7 : vector<16x256xf32>
    %c0_6 = arith.constant 0 : index
    %c0_7 = arith.constant 0 : index
    %9 = vector.load %arg4[%c0_6, %c0_7] : memref<256x8xf32, #tpu.memory_space<vmem>>, vector<256x8xf32>
    %cst_8 = arith.constant dense<0.000000e+00> : vector<16x8xf32>
    %10 = tpu.matmul %8, %9, %cst_8 {dimension_numbers = #tpu.dot_dimension_numbers<[1], [0], [0], [1], [0, 0, 1, 1], [], []>} : vector<16x256xf32>, vector<256x8xf32>, vector<16x8xf32> -> vector<16x8xf32>
    %c0_9 = arith.constant 0 : index
    %c0_10 = arith.constant 0 : index
    %11 = memref.load %arg5[%c0_9, %c0_10] : memref<1x1xf32, #tpu.memory_space<smem>>
    %12 = vector.broadcast %11 : f32 to vector<16x8xf32>
    %13 = arith.addf %10, %12 : vector<16x8xf32>
    %cst_11 = arith.constant 0.000000e+00 : f32
    %14 = vector.broadcast %cst_11 : f32 to vector<16x8xf32>
    %15 = arith.subf %14, %13 : vector<16x8xf32>
    %16 = math.exp %15 : vector<16x8xf32>
    %cst_12 = arith.constant 1.000000e+00 : f32
    %17 = vector.broadcast %cst_12 : f32 to vector<16x8xf32>
    %18 = arith.addf %17, %16 : vector<16x8xf32>
    %19 = tpu.reciprocal %18 {approx = true} : vector<16x8xf32> -> vector<16x8xf32>
    %c0_13 = arith.constant 0 : index
    %c0_14 = arith.constant 0 : index
    %20 = vector.load %arg6[%c0_13, %c0_14] : memref<16x8xf32, #tpu.memory_space<vmem>>, vector<16x8xf32>
    tpu.vector_store %arg6[%c0_13, %c0_14], %19 {strides = array<i32>} : memref<16x8xf32, #tpu.memory_space<vmem>>, vector<16x8xf32>,
    return
  }
  func.func @transform_0(%arg0: i32) -> (i32, i32) {
    %c0_i32 = arith.constant 0 : i32
    %c0_i32_0 = arith.constant 0 : i32
    return %arg0, %c0_i32 : i32, i32
  }
  func.func @transform_1(%arg0: i32) -> (i32, i32) {
    %c0_i32 = arith.constant 0 : i32
    %c0_i32_0 = arith.constant 0 : i32
    %c0_i32_1 = arith.constant 0 : i32
    return %c0_i32, %c0_i32_0 : i32, i32
  }
  func.func @transform_2(%arg0: i32) -> (i32, i32) {
    %c0_i32 = arith.constant 0 : i32
    %c0_i32_0 = arith.constant 0 : i32
    %c0_i32_1 = arith.constant 0 : i32
    return %c0_i32, %c0_i32_0 : i32, i32
  }
  func.func @transform_3(%arg0: i32) -> (i32, i32) {
    %c0_i32 = arith.constant 0 : i32
    %c0_i32_0 = arith.constant 0 : i32
    %c0_i32_1 = arith.constant 0 : i32
    return %c0_i32, %c0_i32_0 : i32, i32
  }
  func.func @transform_4(%arg0: i32) -> (i32, i32) {
    %c0_i32 = arith.constant 0 : i32
    %c0_i32_0 = arith.constant 0 : i32
    %c0_i32_1 = arith.constant 0 : i32
    return %c0_i32, %c0_i32_0 : i32, i32
  }
  func.func @transform_5(%arg0: i32) -> (i32, i32) {
    %c0_i32 = arith.constant 0 : i32
    %c0_i32_0 = arith.constant 0 : i32
    return %arg0, %c0_i32 : i32, i32
  }
}

</mosaic_0001>

<bundles_post_ra>
// kernel: pollution_mlp_forward.1
= control target key start
LH: loop header
LB: loop body
LE: loop exit
PB: predicated region body
PF: predicated region fallthrough
CT: control target
= control target key end

     0   :  { %vm248_vm0 = vcmask 64512   ;;  %s583_s1 = inlined_call_operand.vmem [shape: bf16[128,256], index: 1, kind: input, shape index: {}]   ;;  %s584_s3 = inlined_call_operand.vmem [shape: f32[256,8], index: 3, kind: input, shape index: {}]   ;;  %s585_s0 = inlined_call_operand.vmem [shape: f32[16,128], index: 0, kind: input, shape index: {}]   ;;  %s586_s2 = inlined_call_operand.vmem [shape: f32[1,256], index: 2, kind: input, shape index: {}]   ;;  %s587_s4 = inlined_call_operand.<no memory space> [shape: f32[1,1], index: 4, kind: input, shape index: {}]   ;;  %s588_s5 = inlined_call_operand.vmem [shape: f32[16,8], index: 5, kind: output, shape index: {}]  }
   0x1   :  { %v313_v0 = vld [vmem:[%s583_s1 + $0x70] sm:$0xf]  ;;  %v334_v1 = vld [vmem:[%s583_s1 + $0x74] sm:$0xf0]  ;;  %v333_v2 = vld [vmem:[%s583_s1 + $0x74] sm:$0xf] }
   0x2   :  { %v314_v3 = vor.u32 %v334_v1, %v313_v0  ;;  %v315_v4 = vld [vmem:[%s583_s1 + $0x78] sm:$0xf0]  ;;  %v305_v5 = vld [vmem:[%s583_s1 + $0x60] sm:$0xf]  ;;  %v332_v6 = vld [vmem:[%s583_s1 + $0x64] sm:$0xf0] }
   0x3   :  { %v318_v7 = vor.u32 %v333_v2, %v315_v4  ;;  %v331_v8 = vld [vmem:[%s583_s1 + $0x64] sm:$0xf]  ;;  %v307_v9 = vld [vmem:[%s583_s1 + $0x68] sm:$0xf0]  ;;  %v306_v10 = vor.u32 %v332_v6, %v305_v5  ;;  %v297_v12 = vld [vmem:[%s583_s1 + $0x50] sm:$0xf] }
   0x4   :  { %126 = vmatpush.bf16.msra.mxu0 %v314_v3  ;;  %v310_v11 = vor.u32 %v331_v8, %v307_v9  ;;  %v330_v13 = vld [vmem:[%s583_s1 + $0x54] sm:$0xf0]  ;;  %v329_v14 = vld [vmem:[%s583_s1 + $0x54] sm:$0xf]  ;;  %v299_v15 = vld [vmem:[%s583_s1 + $0x58] sm:$0xf0] }
   0x5   :  { %140 = vmatpush.bf16.msra.mxu1 %v318_v7  ;;  %v298_v16 = vor.u32 %v330_v13, %v297_v12  ;;  %v302_v17 = vor.u32 %v329_v14, %v299_v15  ;;  %v289_v18 = vld [vmem:[%s583_s1 + $0x40] sm:$0xf]  ;;  %v328_v19 = vld [vmem:[%s583_s1 + $0x44] sm:$0xf0]  ;;  %v327_v20 = vld [vmem:[%s583_s1 + $0x44] sm:$0xf] }
   0x6   :  { %v291_v21 = vld [vmem:[%s583_s1 + $0x48] sm:$0xf0]  ;;  %v290_v22 = vor.u32 %v328_v19, %v289_v18  ;;  %v281_v23 = vld [vmem:[%s583_s1 + $0x30] sm:$0xf]  ;;  %v173_v24 = vld [vmem:[%s584_s3 + $0x78] sm:$0xff] }
   0x7   :  { %v189_v25 = vld [vmem:[%s584_s3 + $0xf8] sm:$0xff]  ;;  %v294_v26 = vor.u32 %v327_v20, %v291_v21  ;;  %192 = vmatpush.msra.mxu2 %v173_v24  ;;  %v172_v28 = vld [vmem:[%s584_s3 + $0x70] sm:$0xff]  ;;  %v171_v32 = vld [vmem:[%s584_s3 + $0x68] sm:$0xff] }
   0x8   :  { %127 = vmatpush.bf16.msra.mxu0 %v306_v10  ;;  %v326_v27 = vld [vmem:[%s583_s1 + $0x34] sm:$0xf0]  ;;  %v188_v29 = vld [vmem:[%s584_s3 + $0xf0] sm:$0xff]  ;;  %v283_v31 = vld [vmem:[%s583_s1 + $0x38] sm:$0xf0]  ;;  %215 = vmatpush.msra.mxu3 %v189_v25 }
   0x9   :  { %141 = vmatpush.bf16.msra.mxu1 %v310_v11  ;;  %v325_v30 = vld [vmem:[%s583_s1 + $0x34] sm:$0xf]  ;;  %193 = vmatpush.msra.mxu2 %v172_v28  ;;  %v187_v33 = vld [vmem:[%s584_s3 + $0xe8] sm:$0xff]  ;;  %v282_v34 = vor.u32 %v326_v27, %v281_v23  ;;  %v170_v35 = vld [vmem:[%s584_s3 + $0x60] sm:$0xff] }
   0xa   :  { %216 = vmatpush.msra.mxu3 %v188_v29  ;;  %v286_v36 = vor.u32 %v325_v30, %v283_v31  ;;  %v273_v37 = vld [vmem:[%s583_s1 + $0x20] sm:$0xf]  ;;  %v324_v38 = vld [vmem:[%s583_s1 + $0x24] sm:$0xf0]  ;;  %v323_v40 = vld [vmem:[%s583_s1 + $0x24] sm:$0xf] }
   0xb   :  { %194 = vmatpush.msra.mxu2 %v171_v32  ;;  %v186_v39 = vld [vmem:[%s584_s3 + $0xe0] sm:$0xff]  ;;  %v275_v41 = vld [vmem:[%s583_s1 + $0x28] sm:$0xf0]  ;;  %v169_v42 = vld [vmem:[%s584_s3 + $0x58] sm:$0xff]  ;;  %v274_v44 = vor.u32 %v324_v38, %v273_v37 }
   0xc   :  { %128 = vmatpush.bf16.msra.mxu0 %v298_v16  ;;  %217 = vmatpush.msra.mxu3 %v187_v33  ;;  %v185_v43 = vld [vmem:[%s584_s3 + $0xd8] sm:$0xff]  ;;  %v168_v45 = vld [vmem:[%s584_s3 + $0x50] sm:$0xff]  ;;  %v278_v46 = vor.u32 %v323_v40, %v275_v41  ;;  %v167_v52 = vld [vmem:[%s584_s3 + $0x48] sm:$0xff] }
   0xd   :  { %142 = vmatpush.bf16.msra.mxu1 %v302_v17  ;;  %195 = vmatpush.msra.mxu2 %v170_v35  ;;  %v265_v47 = vld [vmem:[%s583_s1 + $0x10] sm:$0xf]  ;;  %v322_v48 = vld [vmem:[%s583_s1 + $0x14] sm:$0xf0]  ;;  %v321_v50 = vld [vmem:[%s583_s1 + $0x14] sm:$0xf] }
   0xe   :  { %218 = vmatpush.msra.mxu3 %v186_v39  ;;  %v184_v49 = vld [vmem:[%s584_s3 + $0xd0] sm:$0xff]  ;;  %v267_v51 = vld [vmem:[%s583_s1 + $0x18] sm:$0xf0]  ;;  %v183_v53 = vld [vmem:[%s584_s3 + $0xc8] sm:$0xff]  ;;  %v266_v54 = vor.u32 %v322_v48, %v265_v47 }
   0xf   :  { %196 = vmatpush.msra.mxu2 %v169_v42  ;;  %v166_v55 = vld [vmem:[%s584_s3 + $0x40] sm:$0xff]  ;;  %v270_v56 = vor.u32 %v321_v50, %v267_v51  ;;  %v320_v58 = vld [vmem:[%s583_s1 + $0x4] sm:$0xf0]  ;;  %v259_v61 = vld [vmem:[%s583_s1 + $0x8] sm:$0xf0] }
  0x10   :  { %129 = vmatpush.bf16.msra.mxu0 %v290_v22  ;;  %219 = vmatpush.msra.mxu3 %v185_v43  ;;  %v257_v57 = vld [vmem:[%s583_s1] sm:$0xf]  ;;  %v319_v60 = vld [vmem:[%s583_s1 + $0x4] sm:$0xf]  ;;  %v165_v62 = vld [vmem:[%s584_s3 + $0x38] sm:$0xff] }
  0x11   :  { %143 = vmatpush.bf16.msra.mxu1 %v294_v26  ;;  %197 = vmatpush.msra.mxu2 %v168_v45  ;;  %v182_v59 = vld [vmem:[%s584_s3 + $0xc0] sm:$0xff]  ;;  %v181_v63 = vld [vmem:[%s584_s3 + $0xb8] sm:$0xff]  ;;  %v258_v0 = vor.u32 %v320_v58, %v257_v57  ;;  %v22_v2 = vld [vmem:[%s585_s0 + $0x8] sm:$0xff]  ;;  %v262_v4 = vor.u32 %v319_v60, %v259_v61 }
  0x12   :  { %220 = vmatpush.msra.mxu3 %v184_v49  ;;  %v21_v1 = vld [vmem:[%s585_s0] sm:$0xff]  ;;  %v164_v3 = vld [vmem:[%s584_s3 + $0x30] sm:$0xff]  ;;  %v163_v6 = vld [vmem:[%s584_s3 + $0x28] sm:$0xff] }
  0x13   :  { %198 = vmatpush.msra.mxu2 %v167_v52  ;;  %v180_v5 = vld [vmem:[%s584_s3 + $0xb0] sm:$0xff]  ;;  %v23_v7 = vpack.c.bf16 %v22_v2, %v21_v1  ;;  %v179_v8 = vld [vmem:[%s584_s3 + $0xa8] sm:$0xff]  ;;  %v162_v9 = vld [vmem:[%s584_s3 + $0x20] sm:$0xff] }
  0x14   :  { %130 = vmatpush.bf16.msra.mxu0 %v282_v34  ;;  %221 = vmatpush.msra.mxu3 %v183_v53  ;;  %v178_v10 = vld [vmem:[%s584_s3 + $0xa0] sm:$0xff]  ;;  %v161_v11 = vld [vmem:[%s584_s3 + $0x18] sm:$0xff]  ;;  %v160_v13 = vld [vmem:[%s584_s3 + $0x10] sm:$0xff]  ;;  %v191_v34 = vstv %s587_s4 }
  0x15   :  { %144 = vmatpush.bf16.msra.mxu1 %v286_v36  ;;  %199 = vmatpush.msra.mxu2 %v166_v55  ;;  %v177_v12 = vld [vmem:[%s584_s3 + $0x98] sm:$0xff]  ;;  %v176_v14 = vld [vmem:[%s584_s3 + $0x90] sm:$0xff]  ;;  %v159_v15 = vld [vmem:[%s584_s3 + $0x8] sm:$0xff] }
  0x16   :  { %222 = vmatpush.msra.mxu3 %v182_v59  ;;  %v175_v16 = vld [vmem:[%s584_s3 + $0x88] sm:$0xff]  ;;  %v158_v17 = vld [vmem:[%s584_s3] sm:$0xff] }
  0x17   :  { %200 = vmatpush.msra.mxu2 %v165_v62  ;;  %v174_v18 = vld [vmem:[%s584_s3 + $0x80] sm:$0xff] }
  0x18   :  { %131 = vmatpush.bf16.msra.mxu0 %v274_v44  ;;  %223 = vmatpush.msra.mxu3 %v181_v63  ;;  %v40_v19 = vld [vmem:[%s586_s2] sm:$0x3] }
  0x19   :  { %145 = vmatpush.bf16.msra.mxu1 %v278_v46  ;;  %201 = vmatpush.msra.mxu2 %v164_v3  ;;  %v42_v20 = vperm.slane %v40_v19, 0  ;;  %v43_v21 = vperm.slane %v40_v19, 1 }
  0x1a   :  { %224 = vmatpush.msra.mxu3 %v180_v5 }
  0x1b   :  { %202 = vmatpush.msra.mxu2 %v163_v6 }
  0x1c   :  { %132 = vmatpush.bf16.msra.mxu0 %v266_v54  ;;  %225 = vmatpush.msra.mxu3 %v179_v8 }
  0x1d   :  { %146 = vmatpush.bf16.msra.mxu1 %v270_v56  ;;  %203 = vmatpush.msra.mxu2 %v162_v9 }
  0x1e   :  { %226 = vmatpush.msra.mxu3 %v178_v10 }
  0x1f   :  { %204 = vmatpush.msra.mxu2 %v161_v11 }
  0x20   :  { %133 = vmatpush.bf16.msra.mxu0 %v258_v0  ;;  %227 = vmatpush.msra.mxu3 %v177_v12 }
  0x21   :  { %147 = vmatpush.bf16.msra.mxu1 %v262_v4  ;;  %205 = vmatpush.msra.mxu2 %v160_v13 }
  0x22   :  { %228 = vmatpush.msra.mxu3 %v176_v14 }
  0x23   :  { %134 = vmatmul.bf16.vlgmr.msra.gmra.mxu0 %v23_v7  ;;  %206 = vmatpush.msra.mxu2 %v159_v15 }
  0x24   :  { %148 = vmatmul.bf16.vlgmr.msra.gmra.mxu1 %v23_v7  ;;  %229 = vmatpush.msra.mxu3 %v175_v16 }
  0x25   :  { %207 = vmatpush.msra.mxu2 %v158_v17 }
  0x26   :  { %230 = vmatpush.msra.mxu3 %v174_v18 }
  0xa0   :  { %v135_v22 = vpop.f32.mrf.mxu0 }
  0xa1   :  { %v136_v23 = vadd.f32 %v135_v22, %v42_v20  ;;  %v149_v24 = vpop.f32.mrf.mxu1 }
  0xa2   :  { %v150_v25 = vadd.f32 %v149_v24, %v43_v21 }
  0xa3   :  { %v154_v26 = vmax.f32 %v136_v23, 0.0 }
  0xa4   :  { %v155_v27 = vmax.f32 %v150_v25, 0.0 }
  0xa5   :  { %208 = vmatmul.f32.vlgmr.msra.gmra.mxu2 %v154_v26 }
  0xa6   :  { %231 = vmatmul.f32.vlgmr.msra.gmra.mxu3 %v155_v27 }
  0xa8   :  { %v137_v28 = vpop.f32.mrf.mxu0 }
  0xa9   :  { %v138_v29 = vadd.f32 %v137_v28, %v42_v20  ;;  %v151_v30 = vpop.f32.mrf.mxu1 }
  0xaa   :  { %v152_v31 = vadd.f32 %v151_v30, %v43_v21 }
  0xab   :  { %v156_v32 = vmax.f32 %v138_v29, 0.0 }
  0xac   :  { %v157_v33 = vmax.f32 %v152_v31, 0.0 }
  0xad   :  { %211 = vmatmul.f32.gmra.mxu2 %v156_v32 }
  0xae   :  { %234 = vmatmul.f32.gmra.mxu3 %v157_v33 }
 0x128   :  { %v209_v35 = vpop.f32.mrf.mxu2 }
 0x129   :  { %v210_v36 = vadd.f32 %v209_v35, %v191_v34  ;;  %v232_v37 = vpop.f32.mrf.mxu3 }
 0x12b   :  { %v233_v38 = vadd.f32 %v232_v37, %v210_v36 }
 0x12d   :  { %v238_v39 = vsub.f32 0.0, %v233_v38 }
 0x12f   :  { %v240_v40 = vmul.f32 1.442695, %v238_v39 }
 0x130   :  { %v212_v41 = vpop.f32.mrf.mxu2 }
 0x131   :  { %335 = vpow2.f32 %v240_v40  ;;  %v213_v42 = vadd.f32 %v212_v41, %v191_v34  ;;  %v235_v43 = vpop.f32.mrf.mxu3 }
 0x133   :  { %v236_v44 = vadd.f32 %v235_v43, %v213_v42 }
 0x135   :  { %v239_v45 = vsub.f32 0.0, %v236_v44 }
 0x137   :  { %v336_v46 = vpop.eup %335  ;;  %v242_v47 = vmul.f32 1.442695, %v239_v45 }
 0x138   :  { %v244_v48 = vadd.f32 1.0, %v336_v46 }
 0x139   :  { %337 = vpow2.f32 %v242_v47 }
 0x13a   :  { %339 = vrcp.f32 %v244_v48 }
 0x13f   :  { %v338_v49 = vpop.eup %337 }
 0x140   :  { %v340_v50 = vpop.eup %339  ;;  %v245_v51 = vadd.f32 1.0, %v338_v49 }
 0x141   :  { %249 = vst.msk [vmem:[%s588_s5] sm:$0xff] %vm248_vm0, %v340_v50 }
 0x142   :  { %341 = vrcp.f32 %v245_v51 }
 0x148   :  { %v342_v52 = vpop.eup %341 }
 0x149   :  { %250 = vst.msk [vmem:[%s588_s5 + $0x8] sm:$0xff] %vm248_vm0, %v342_v52 }

</bundles_post_ra>
